<compile_context>
chip_gen: v7x
topology: tpu7x:2x2x1
jax: 0.10.0
libtpu: 0.0.40
codegen_flags: <defaults>
</compile_context>

<pallas_src>
import functools

import jax
import jax.numpy as jnp
from jax.experimental import pallas as pl
from jax.experimental.pallas import tpu as pltpu

BN_EPS = 1e-5

# Conservative across chips: v5e (16 MiB scoped default / 128 MiB phys), v6e (32 / 128),
# v7x (32 / 64).  Tiles are budgeted to ~24 MiB and the scoped limit raised to 48 MiB so
# the compiler has headroom without approaching v7x's 64 MiB physical VMEM.
_VMEM_BUDGET = 24 * 1024 * 1024
_VMEM_LIMIT = 48 * 1024 * 1024


def _round_up(v, m):
    return (v + m - 1) // m * m


def _bn_relu_epilogue(y, gamma, beta, inv_n):
    """Training-mode BatchNorm1d + ReLU folded into a per-feature scale/shift FMA.

    y is (N, tile_h) f32 where every row is a valid sample (N is never padded) and padded
    H columns are exactly zero, so no batch mask is needed.  Single-pass variance keeps the
    tail to one y*y multiply, two XLU column-sums, a few (1, tile_h) ops (rsqrt on the EUP),
    and one FMA + ReLU over the tile.
    """
    mean = jnp.sum(y, axis=0, keepdims=True) * inv_n
    ex2 = jnp.sum(y * y, axis=0, keepdims=True) * inv_n
    var = jnp.maximum(ex2 - mean * mean, 0.0)          # clamp tiny cancellation error
    scale = gamma * jax.lax.rsqrt(var + BN_EPS)        # rsqrt rides the EUP slot
    shift = beta - mean * scale
    return jnp.maximum(y * scale + shift, 0.0)


def _dnn_cell_kernel(x_ref, wT_ref, p_ref, o_ref, *, inv_n):
    # Small-F path: x (N, F) resident; wT (F, tile_h); p (8, tile_h) rows = [gamma, beta, 0..].
    y = jnp.dot(x_ref[...], wT_ref[...], preferred_element_type=jnp.float32)
    o_ref[...] = _bn_relu_epilogue(
        y, p_ref[0:1, :], p_ref[1:2, :], inv_n
    ).astype(o_ref.dtype)


def _dnn_cell_kernel_ftiled(x_ref, wT_ref, p_ref, o_ref, acc_ref, *, inv_n):
    # grid = (H tiles ["parallel"], F tiles ["arbitrary"]); acc: (N, tile_h) f32 scratch.
    k = pl.program_id(1)

    @pl.when(k == 0)
    def _():
        acc_ref[...] = jnp.zeros_like(acc_ref)

    acc_ref[...] += jnp.dot(x_ref[...], wT_ref[...], preferred_element_type=jnp.float32)

    @pl.when(k == pl.num_programs(1) - 1)
    def _():
        o_ref[...] = _bn_relu_epilogue(
            acc_ref[...], p_ref[0:1, :], p_ref[1:2, :], inv_n
        ).astype(o_ref.dtype)


def _choose_tiles(N, F, H, itemsize, force_f_tile=None):
    # tile_h: 256-wide output tiles fill the v6e/v7x 256x256 MXU; keep >=2 H tiles when H
    # allows it so a "parallel" H grid keeps both v7x TensorCores busy.  H is padded up to
    # the chosen tile (fewer, larger steps instead of a 128-wide fallback).
    if H <= 128:
        tile_h = 128
    elif H <= 1024:
        tile_h = 256
    else:
        tile_h = 512
    H_pad = _round_up(H, tile_h)

    if force_f_tile is not None:
        return tile_h, H_pad, force_f_tile

    # Resident-x (single F step) estimate; the constant-index x block is conservatively
    # charged for the default 2 pipeline buffers.
    resident = (2 * N * F * itemsize
                + 2 * F * tile_h * itemsize
                + 2 * 8 * tile_h * 4
                + 2 * N * tile_h * 4)
    if resident <= _VMEM_BUDGET:
        return tile_h, H_pad, None

    # Otherwise stream the contraction axis: pipelined (N, tile_f) x (tile_f, tile_h) blocks
    # plus an (N, tile_h) f32 accumulator in scratch.
    tile_f = 512

    def tiled_cost(th, tf):
        return (2 * N * tf * itemsize + 2 * tf * th * itemsize
                + 2 * 8 * th * 4 + 2 * N * th * 4 + N * th * 4)

    while tile_f > 128 and (tiled_cost(tile_h, tile_f) > _VMEM_BUDGET
                            or tile_f > _round_up(F, 128)):
        tile_f //= 2
    while tile_h > 128 and tiled_cost(tile_h, tile_f) > _VMEM_BUDGET:
        tile_h //= 2
        H_pad = _round_up(H, tile_h)
    # TODO(synk): very large N would additionally need an N-tiled two-phase BatchNorm
    # reduction (cross-tile mean/var); not implemented here.
    return tile_h, H_pad, tile_f


def dnn_cell_forward(x, w, b, gamma, beta, *, mxu_bf16=False, _force_f_tile=None):
    """Forward pass of DNNCell.

    x: (N, F) f32; w: (H, F) (torch nn.Linear layout); b/gamma/beta: (H,).
    `b` is accepted for API parity but unused: under training-mode BatchNorm the Linear
    bias shifts y and mean(y) by the same amount and cancels exactly.
    """
    del b
    N, F = x.shape
    H = w.shape[0]

    comp_dtype = jnp.bfloat16 if mxu_bf16 else jnp.float32
    isz = jnp.dtype(comp_dtype).itemsize

    tile_h, H_pad, tile_f = _choose_tiles(N, F, H, isz, _force_f_tile)

    # Pre-transpose the (static) weight once in the wrapper -> straight (N,F)x(F,H) MXU feed
    # with a lane-dense H output, no in-kernel transpose.
    wT = w.astype(comp_dtype).T                       # (F, H)
    if H_pad != H:
        wT = jnp.pad(wT, ((0, 0), (0, H_pad - H)))

    # gamma/beta packed into ONE resident (8, H_pad) slab -> a single small DMA per H tile.
    params = (
        jnp.zeros((8, H_pad), jnp.float32)
        .at[0, :H].set(gamma.astype(jnp.float32))
        .at[1, :H].set(beta.astype(jnp.float32))
    )

    x_in = x.astype(comp_dtype)       # bf16 cast (if any) happens once, in HBM
    inv_n = 1.0 / N                   # static -> distinct batch sizes recompile (operational only)

    if tile_f is None:
        # Small-F path: x stays resident; no padding of x at all.
        kernel = functools.partial(_dnn_cell_kernel, inv_n=inv_n)
        grid = (H_pad // tile_h,)
        in_specs = [
            pl.BlockSpec((N, F), lambda j: (0, 0)),        # x: full-extent, constant index
            pl.BlockSpec((F, tile_h), lambda j: (0, j)),   # W^T: H-tiled, lane-dense
            pl.BlockSpec((8, tile_h), lambda j: (0, j)),   # gamma/beta slab
        ]
        out_specs = pl.BlockSpec((N, tile_h), lambda j: (0, j))
        scratch_shapes = ()
        dim_sem = ("parallel",)
    else:
        F_pad = _round_up(F, tile_f)
        if F_pad != F:
            x_in = jnp.pad(x_in, ((0, 0), (0, F_pad - F)))
            wT = jnp.pad(wT, ((0, F_pad - F), (0, 0)))
        kernel = functools.partial(_dnn_cell_kernel_ftiled, inv_n=inv_n)
        grid = (H_pad // tile_h, F_pad // tile_f)          # reduction axis last
        in_specs = [
            pl.BlockSpec((N, tile_f), lambda j, k: (0, k)),
            pl.BlockSpec((tile_f, tile_h), lambda j, k: (k, j)),
            pl.BlockSpec((8, tile_h), lambda j, k: (0, j)),
        ]
        out_specs = pl.BlockSpec((N, tile_h), lambda j, k: (0, j))
        scratch_shapes = (pltpu.VMEM((N, tile_h), jnp.float32),)
        dim_sem = ("parallel", "arbitrary")

    out_p = pl.pallas_call(
        kernel,
        out_shape=jax.ShapeDtypeStruct((N, H_pad), jnp.float32),
        grid_spec=pltpu.PrefetchScalarGridSpec(
            num_scalar_prefetch=0,
            grid=grid,
            in_specs=in_specs,
            out_specs=out_specs,
            scratch_shapes=scratch_shapes,
        ),
        compiler_params=pltpu.CompilerParams(
            dimension_semantics=dim_sem,
            vmem_limit_bytes=_VMEM_LIMIT,
        ),
    )(x_in, wT, params)

    return out_p[:, :H]


def xavier_uniform(key, out_features, in_features):
    # torch.nn.init.xavier_uniform_ : U(-a, a), a = sqrt(6 / (fan_in + fan_out))
    a = (6.0 / (in_features + out_features)) ** 0.5
    return jax.random.uniform(
        key, (out_features, in_features), minval=-a, maxval=a, dtype=jnp.float32
    )


def _reference(x, w, b, gamma, beta):
    # Pure-JAX DNNCell forward (training-mode BatchNorm1d, biased variance).
    y = x @ w.T + b
    mean = jnp.mean(y, axis=0, keepdims=True)
    var = jnp.mean((y - mean) ** 2, axis=0, keepdims=True)
    return jnp.maximum((y - mean) / jnp.sqrt(var + BN_EPS) * gamma + beta, 0.0)


if __name__ == "__main__":
    # --- Test 1: the module's nominal small shape (single-F resident path) ---
    batch, input_size, hidden_size = 8, 16, 32
    key = jax.random.PRNGKey(0)
    kx, kw, kb = jax.random.split(key, 3)

    x = jax.random.normal(kx, (batch, input_size), dtype=jnp.float32)
    w = xavier_uniform(kw, hidden_size, input_size)             # fc.weight (H, F)
    bound = 1.0 / (input_size ** 0.5)                           # default Linear bias init
    b = jax.random.uniform(kb, (hidden_size,), minval=-bound, maxval=bound,
                           dtype=jnp.float32)                   # fc.bias (H,)
    gamma = jnp.ones((hidden_size,), dtype=jnp.float32)         # bn.weight
    beta = jnp.zeros((hidden_size,), dtype=jnp.float32)         # bn.bias

    out = dnn_cell_forward(x, w, b, gamma, beta)
    jax.block_until_ready(out)
    ref = _reference(x, w, b, gamma, beta)
    assert out.shape == ref.shape, "shape mismatch vs reference"
    assert jnp.allclose(out, ref, atol=1e-4, rtol=1e-4), "mismatch vs reference"

    # --- Test 2: exercise the F-tiled accumulator path (multi H tiles, H padding) ---
    k2x, k2w, k2b = jax.random.split(jax.random.PRNGKey(1), 3)
    N2, F2, H2 = 16, 256, 384
    x2 = jax.random.normal(k2x, (N2, F2), dtype=jnp.float32)
    w2 = xavier_uniform(k2w, H2, F2)
    bound2 = 1.0 / (F2 ** 0.5)
    b2 = jax.random.uniform(k2b, (H2,), minval=-bound2, maxval=bound2, dtype=jnp.float32)
    g2 = jnp.ones((H2,), dtype=jnp.float32)
    be2 = jnp.zeros((H2,), dtype=jnp.float32)

    out2 = dnn_cell_forward(x2, w2, b2, g2, be2, _force_f_tile=128)
    jax.block_until_ready(out2)
    ref2 = _reference(x2, w2, b2, g2, be2)
    assert out2.shape == ref2.shape, "shape mismatch vs reference (F-tiled path)"
    assert jnp.allclose(out2, ref2, atol=1e-4, rtol=1e-4), "mismatch vs reference (F-tiled path)"

    print("KERNEL_OK")
</pallas_src>

<mosaic_0001>
module attributes {stable_mosaic.version = 11 : i64} {
  func.func @_dnn_cell_kernel(%arg0: i32, %arg1: memref<8x16xf32, #tpu.memory_space<vmem>>, %arg2: memref<16x128xf32, #tpu.memory_space<vmem>>, %arg3: memref<8x128xf32, #tpu.memory_space<vmem>>, %arg4: memref<8x128xf32, #tpu.memory_space<vmem>>) attributes {dimension_semantics = [#tpu.dimension_semantics<parallel>], iteration_bounds = array<i64: 1>, scalar_prefetch = 0 : i64, scratch_operands = 0 : i64, tpu.core_type = #tpu.core_type<tc>, window_params = [{pipeline_mode = #tpu.pipeline_mode<synchronous>, transform_indices = @transform_0, window_bounds = array<i64: 8, 16>}, {transform_indices = @transform_1, window_bounds = array<i64: 16, 128>}, {transform_indices = @transform_2, window_bounds = array<i64: 8, 128>}, {transform_indices = @transform_3, window_bounds = array<i64: 8, 128>}]} {
    %c0 = arith.constant 0 : index
    %c0_0 = arith.constant 0 : index
    %0 = vector.load %arg1[%c0, %c0_0] : memref<8x16xf32, #tpu.memory_space<vmem>>, vector<8x16xf32>
    %c0_1 = arith.constant 0 : index
    %c0_2 = arith.constant 0 : index
    %1 = vector.load %arg2[%c0_1, %c0_2] : memref<16x128xf32, #tpu.memory_space<vmem>>, vector<16x128xf32>
    %cst = arith.constant dense<0.000000e+00> : vector<8x128xf32>
    %2 = tpu.matmul %0, %1, %cst {dimension_numbers = #tpu.dot_dimension_numbers<[1], [0], [0], [1], [0, 0, 1, 1], [], []>} : vector<8x16xf32>, vector<16x128xf32>, vector<8x128xf32> -> vector<8x128xf32>
    %c0_3 = arith.constant 0 : index
    %c0_4 = arith.constant 0 : index
    %3 = vector.load %arg3[%c0_3, %c0_4] : memref<8x128xf32, #tpu.memory_space<vmem>>, vector<1x128xf32>
    %c1 = arith.constant 1 : index
    %c0_5 = arith.constant 0 : index
    %4 = vector.load %arg3[%c1, %c0_5] : memref<8x128xf32, #tpu.memory_space<vmem>>, vector<1x128xf32>
    %cst_6 = arith.constant dense<0.000000e+00> : vector<128xf32>
    %5 = vector.multi_reduction <add>, %2, %cst_6 [0] : vector<8x128xf32> to vector<128xf32>
    %6 = vector.shape_cast %5 : vector<128xf32> to vector<1x128xf32>
    %cst_7 = arith.constant 1.250000e-01 : f32
    %7 = vector.broadcast %cst_7 : f32 to vector<1x128xf32>
    %8 = arith.mulf %6, %7 : vector<1x128xf32>
    %9 = arith.mulf %2, %2 : vector<8x128xf32>
    %cst_8 = arith.constant dense<0.000000e+00> : vector<128xf32>
    %10 = vector.multi_reduction <add>, %9, %cst_8 [0] : vector<8x128xf32> to vector<128xf32>
    %11 = vector.shape_cast %10 : vector<128xf32> to vector<1x128xf32>
    %cst_9 = arith.constant 1.250000e-01 : f32
    %12 = vector.broadcast %cst_9 : f32 to vector<1x128xf32>
    %13 = arith.mulf %11, %12 : vector<1x128xf32>
    %14 = arith.mulf %8, %8 : vector<1x128xf32>
    %15 = arith.subf %13, %14 : vector<1x128xf32>
    %cst_10 = arith.constant 0.000000e+00 : f32
    %16 = vector.broadcast %cst_10 : f32 to vector<1x128xf32>
    %17 = arith.maximumf %15, %16 : vector<1x128xf32>
    %cst_11 = arith.constant 9.99999974E-6 : f32
    %18 = vector.broadcast %cst_11 : f32 to vector<1x128xf32>
    %19 = arith.addf %17, %18 : vector<1x128xf32>
    %20 = math.rsqrt %19 : vector<1x128xf32>
    %21 = arith.mulf %3, %20 : vector<1x128xf32>
    %22 = arith.mulf %8, %21 : vector<1x128xf32>
    %23 = arith.subf %4, %22 : vector<1x128xf32>
    %24 = vector.broadcast %21 : vector<1x128xf32> to vector<8x128xf32>
    %25 = arith.mulf %2, %24 : vector<8x128xf32>
    %26 = vector.broadcast %23 : vector<1x128xf32> to vector<8x128xf32>
    %27 = arith.addf %25, %26 : vector<8x128xf32>
    %cst_12 = arith.constant 0.000000e+00 : f32
    %28 = vector.broadcast %cst_12 : f32 to vector<8x128xf32>
    %29 = arith.maximumf %27, %28 : vector<8x128xf32>
    %c0_13 = arith.constant 0 : index
    %c0_14 = arith.constant 0 : index
    %30 = vector.load %arg4[%c0_13, %c0_14] : memref<8x128xf32, #tpu.memory_space<vmem>>, vector<8x128xf32>
    tpu.vector_store %arg4[%c0_13, %c0_14], %29 {strides = array<i32>} : memref<8x128xf32, #tpu.memory_space<vmem>>, vector<8x128xf32>,
    return
  }
  func.func @transform_0(%arg0: i32) -> (i32, i32) {
    %c0_i32 = arith.constant 0 : i32
    %c0_i32_0 = arith.constant 0 : i32
    %c0_i32_1 = arith.constant 0 : i32
    return %c0_i32, %c0_i32_0 : i32, i32
  }
  func.func @transform_1(%arg0: i32) -> (i32, i32) {
    %c0_i32 = arith.constant 0 : i32
    %c0_i32_0 = arith.constant 0 : i32
    return %c0_i32, %arg0 : i32, i32
  }
  func.func @transform_2(%arg0: i32) -> (i32, i32) {
    %c0_i32 = arith.constant 0 : i32
    %c0_i32_0 = arith.constant 0 : i32
    return %c0_i32, %arg0 : i32, i32
  }
  func.func @transform_3(%arg0: i32) -> (i32, i32) {
    %c0_i32 = arith.constant 0 : i32
    %c0_i32_0 = arith.constant 0 : i32
    return %c0_i32, %arg0 : i32, i32
  }
}

</mosaic_0001>

<bundles_post_ra>
// kernel: tpu_custom_call.1
= control target key start
LH: loop header
LB: loop body
LE: loop exit
PB: predicated region body
PF: predicated region fallthrough
CT: control target
= control target key end

     0   :  { %8 = vsyncpa [#allocation3], 0  ;;  %s378_s0 = inlined_call_operand.hbm [shape: f32[8,16], index: 0, kind: input, shape index: {}]   ;;  %s379_s1 = inlined_call_operand.hbm [shape: f32[16,128], index: 1, kind: input, shape index: {}]   ;;  %s380_s2 = inlined_call_operand.hbm [shape: f32[8,128], index: 2, kind: input, shape index: {}]   ;;  %s381_s3 = inlined_call_operand.hbm [shape: f32[8,128], index: 3, kind: output, shape index: {}]  }
   0x1   :  { %9 = vsyncpa [#allocation6], 0 }
   0x2   :  { %10 = vsyncpa [#allocation4], 0  ;;  %s301_s12 = smov [#allocation5]   ;;  %s207_s16 = scalar_lea.hbm %s379_s1, 256 }
   0x3   :  { %s26_s13 = sshll.u32 %s301_s12, 4  ;;  %p208_p0 = scmp.ne.s32.totalorder %s379_s1, %s207_s16  ;;  %s27_s13 = int_to_ptr.vmem [resolvable:$true] %s26_s13 }
   0x4   :  { %p211_p1 = scmp.lt.u32.totalorder %s207_s16, %s379_s1 }
   0x6   :  { %p213_p2 = pnand %p211_p1, %p208_p0 }
   0x8   :  { %216 = shalt.err (!%p213_p2)
}
   0x9   :  { %s217_s21 = scalar_lea.vmem %s27_s13, 256  ;;  %p222_p4 = scmp.lt.s32.totalorder %s27_s13, %s27_s13 }
   0xa   :  { %p218_p3 = scmp.ne.s32.totalorder %s27_s13, %s217_s21  ;;  %p223_p5 = scmp.lt.s32.totalorder %s217_s21, %s217_s21 }
   0xc   :  { %p224_p6 = por %p223_p5, %p222_p4 }
   0xe   :  { %p225_p7 = pnand %p224_p6, %p218_p3 }
  0x10   :  { %228 = shalt.err (!%p225_p7)
}
  0x11   :  { %s302_s22 = smov 128   ;;  %s303_s23 = smov 8  }
  0x12   :  { %32 = dma.hbm_to_vmem [thread:$0]  %s379_s1, 256, %s27_s13, [#allocation6], %s302_s22, %s302_s22, %s303_s23  }
  0x13   :  { %s304_s26 = smov [#allocation2]   ;;  %s305_s28 = smov [#allocation7]  }
  0x14   :  { %s17_s27 = sshll.u32 %s304_s26, 4  ;;  %s39_s29 = sshll.u32 %s305_s28, 4  ;;  %s18_s27 = int_to_ptr.vmem [resolvable:$true] %s17_s27  ;;  %s40_s29 = int_to_ptr.vmem [resolvable:$true] %s39_s29 }
  0x15   :  { %s229_s5 = scalar_lea.hbm %s378_s0, 128 }
  0x16   :  { %p230_p8 = scmp.ne.s32.totalorder %s378_s0, %s229_s5  ;;  %p233_p9 = scmp.lt.u32.totalorder %s229_s5, %s378_s0 }
  0x18   :  { %p235_p10 = pnand %p233_p9, %p230_p8 }
  0x1a   :  { %238 = shalt.err (!%p235_p10)
}
  0x1b   :  { %s239_s1 = scalar_lea.vmem %s18_s27, 128  ;;  %p244_p12 = scmp.lt.s32.totalorder %s18_s27, %s18_s27 }
  0x1c   :  { %p240_p11 = scmp.ne.s32.totalorder %s18_s27, %s239_s1  ;;  %p245_p13 = scmp.lt.s32.totalorder %s239_s1, %s239_s1 }
  0x1e   :  { %p246_p0 = por %p245_p13, %p244_p12 }
  0x20   :  { %p247_p1 = pnand %p246_p0, %p240_p11 }
  0x22   :  { %250 = shalt.err (!%p247_p1)
}
  0x23   :  { %20 = dma.hbm_to_vmem [thread:$0]  %s378_s0, 128, %s18_s27, [#allocation3]  }
  0x24   :  { %s251_s14 = scalar_lea.hbm %s380_s2, 128 }
  0x25   :  { %p252_p2 = scmp.ne.s32.totalorder %s380_s2, %s251_s14  ;;  %p255_p3 = scmp.lt.u32.totalorder %s251_s14, %s380_s2 }
  0x27   :  { %p257_p4 = pnand %p255_p3, %p252_p2 }
  0x29   :  { %260 = shalt.err (!%p257_p4)
}
  0x2a   :  { %s261_s19 = scalar_lea.vmem %s40_s29, 128  ;;  %p266_p6 = scmp.lt.s32.totalorder %s40_s29, %s40_s29 }
  0x2b   :  { %p262_p5 = scmp.ne.s32.totalorder %s40_s29, %s261_s19  ;;  %p267_p7 = scmp.lt.s32.totalorder %s261_s19, %s261_s19 }
  0x2d   :  { %p268_p8 = por %p267_p7, %p266_p6 }
  0x2f   :  { %p269_p9 = pnand %p268_p8, %p262_p5 }
  0x31   :  { %272 = shalt.err (!%p269_p9)
}
  0x32   :  { %42 = dma.hbm_to_vmem [thread:$0]  %s380_s2, 128, %s40_s29, [#allocation6]  }
  0x33   :  { %295 = dma.done.wait [#allocation3], 128  }
  0x34   :  { %296 = vsyncadd [#allocation3], 4294967168 }
  0x35   :  { %297 = dma.done.wait [#allocation6], 384  }
  0x36   :  { %298 = vsyncadd [#allocation6], 4294966912  ;;  %v306_v0 = vmov 0.0|0.0   ;;  %vm307_vm0 = vmmov 0   ;;  %v308_v1 = vmov 0.0   ;;  %v53_v2 = vld [vmem:[#allocation5] sm:$0xff]  ;;  %v154_v27 = vlaneseq }
  0x37   :  { %193 = vmatprep.subr.bf16.mxu0 %v306_v0  ;;  %190 = vmatprep.mubr.msk.f32.mxu0 %vm307_vm0, %v308_v1  ;;  %v54_v3 = vld [vmem:[#allocation5 + $0x8] sm:$0xff]  ;;  %v52_v5 = vld [vmem:[#allocation2] sm:$0xff]  ;;  %vm55_vm1 = vcmask 130048   ;;  %v129_v29 = vld [vmem:[#allocation7] sm:$0x1]  ;;  %s309_s2 = smov [#allocation8]  }
  0x38   :  { %v194_v4 = vpack.c.bf16 %v54_v3, %v53_v2  ;;  %v155_v28 = vshrl.u32 %v154_v27, 7  ;;  %v130_v33 = vld [vmem:[#allocation7 + $0x1] sm:$0x1]  ;;  %s172_s21 = sshll.u32 %s309_s2, 4  ;;  %s173_s21 = int_to_ptr.vmem [resolvable:$true] %s172_s21 }
  0x39   :  { %s273_s22 = scalar_lea.vmem %s173_s21, 128  ;;  %p278_p11 = scmp.lt.s32.totalorder %s173_s21, %s173_s21 }
  0x3a   :  { %195 = vmatpush3.bf16.msra.mxu0 %v194_v4  ;;  %v156_v30 = vsub.s32 0, %v155_v28  ;;  %p274_p10 = scmp.ne.s32.totalorder %s173_s21, %s273_s22  ;;  %p279_p12 = scmp.lt.s32.totalorder %s273_s22, %s273_s22 }
  0x3c   :  { %p280_p13 = por %p279_p12, %p278_p11 }
  0x3d   :  { %191 = vmatmul.mubr.msk.f32.vlgmr.msra.gmra.mrb[0].mxu0 %vm55_vm1, %v52_v5 }
  0x3e   :  { %p281_p0 = pnand %p280_p13, %p274_p10 }
 0x110   :  { %v125_v6 = vpop.f32.mrb[0].mxu0 }
 0x111   :  { %v131_v7 = vrot.slane %v125_v6, 4  ;;  %v138_v8 = vmul.f32 %v125_v6, %v125_v6  ;;  %v192_v9 = vpop.f32.mrb[1].mxu0 }
 0x113   :  { %v132_v10 = vadd.f32 %v131_v7, %v125_v6  ;;  %v139_v11 = vrot.slane %v138_v8, 4 }
 0x115   :  { %v133_v12 = vrot.slane %v132_v10, 2  ;;  %v140_v13 = vadd.f32 %v139_v11, %v138_v8 }
 0x117   :  { %v134_v14 = vadd.f32 %v133_v12, %v132_v10  ;;  %v141_v15 = vrot.slane %v140_v13, 2 }
 0x119   :  { %v135_v16 = vrot.slane %v134_v14, 1  ;;  %v142_v17 = vadd.f32 %v141_v15, %v140_v13 }
 0x11b   :  { %v136_v18 = vadd.f32 %v135_v16, %v134_v14  ;;  %v143_v19 = vrot.slane %v142_v17, 1 }
 0x11d   :  { %v137_v20 = vmul.f32 0.125, %v136_v18  ;;  %v144_v21 = vadd.f32 %v143_v19, %v142_v17 }
 0x11f   :  { %v145_v22 = vmul.f32 0.125, %v144_v21  ;;  %v146_v23 = vmul.f32 %v137_v20, %v137_v20 }
 0x121   :  { %v147_v24 = vsub.f32 %v145_v22, %v146_v23 }
 0x123   :  { %v148_v25 = vmax.f32 %v147_v24, 0.0 }
 0x125   :  { %v149_v26 = vadd.f32 1e-05, %v148_v25 }
 0x127   :  { %205 = vrsqrt.f32 %v149_v26 }
 0x131   :  { %v206_v31 = vpop.eup %205 }
 0x132   :  { %v151_v32 = vmul.f32 %v206_v31, %v129_v29 }
 0x134   :  { %v157_v34 = vrot.slane %v151_v32, %v156_v30  ;;  %v152_v35 = vmul.f32 %v151_v32, %v137_v20 }
 0x136   :  { %v153_v36 = vsub.f32 %v130_v33, %v152_v35  ;;  %v158_v37 = vmul.f32 %v157_v34, %v125_v6 }
 0x138   :  { %v162_v38 = vrot.slane %v153_v36, %v156_v30 }
 0x13a   :  { %v163_v39 = vadd.f32 %v162_v38, %v158_v37 }
 0x13c   :  { %v164_v40 = vmax.f32 %v163_v39, 0.0 }
 0x13e   :  { %165 = vst [vmem:[#allocation8] sm:$0xff] %v164_v40 }
 0x13f   :  { %284 = shalt.err (!%p281_p0)
}
 0x140   :  { %s285_s25 = scalar_lea.hbm %s381_s3, 128 }
 0x141   :  { %p286_p1 = scmp.ne.s32.totalorder %s381_s3, %s285_s25  ;;  %p289_p2 = scmp.lt.u32.totalorder %s285_s25, %s381_s3 }
 0x143   :  { %p291_p3 = pnand %p289_p2, %p286_p1 }
 0x145   :  { %294 = shalt.err (!%p291_p3)
}
 0x146   :  { %175 = dma.vmem_to_hbm [thread:$0]  %s173_s21, 128, %s381_s3, [#allocation4]  }
 0x147   :  { %299 = dma.done.wait [#allocation4], 128  }
 0x148   :  { %300 = vsyncadd [#allocation4], 4294967168 }
 0x149   :  { %179 = vsyncpa [#allocation3], 1 }
 0x14a   :  { %180 = vsyncpa [#allocation6], 1 }
 0x14b   :  { %181 = vsyncpa [#allocation4], 1 }

</bundles_post_ra>
